<compile_context>
chip_gen: v7x
topology: tpu7x:2x2x1
jax: 0.10.0
libtpu: 0.0.40
codegen_flags: <defaults>
</compile_context>

<pallas_src>
import math

import jax
import jax.numpy as jnp
from jax.experimental import pallas as pl
from jax.experimental.pallas import tpu as pltpu

GEN_INPUT = 100            # generatorinput
HIDDEN = 3 * 10 * 10       # 300
IMG_SHAPE = (8, 16, 3)     # small stand-in for inputsize = [218, 178, 3]
OUT_DIM = IMG_SHAPE[0] * IMG_SHAPE[1] * IMG_SHAPE[2]   # 384 -> lane-dense
LN_EPS = 1e-5
LEAKY_SLOPE = 0.01         # PyTorch nn.LeakyReLU default negative_slope

# Lane-dense padded dims (multiples of 128); pad entries carry exact zeros.
GEN_INPUT_PAD = 128
HIDDEN_PAD = 384

# Batch tile (sublane aligned).  Bump to 128/256 for throughput workloads.
BATCH_TILE = 8


def _generator_kernel(x_ref, w1_ref, b1_ref, w2_ref, b2_ref, out_ref):
    """Fused MLP forward: Linear -> LeakyReLU -> LayerNorm -> Linear -> Sigmoid.

    x_ref:  [TB, GEN_INPUT_PAD] bf16 (zero-padded latent)
    w1_ref: [GEN_INPUT_PAD, HIDDEN_PAD] bf16 (zero-padded)
    b1_ref: [1, HIDDEN_PAD] f32 (zero-padded)
    w2_ref: [HIDDEN_PAD, OUT_DIM] bf16 (gamma folded in; pad rows zero)
    b2_ref: [1, OUT_DIM] f32 (beta @ w2 folded in)
    """
    # Linear(GEN_INPUT, HIDDEN) — MXU bf16 operands, f32 accumulation.
    h = jnp.dot(x_ref[...], w1_ref[...], preferred_element_type=jnp.float32)
    h = h + b1_ref[...]

    # LeakyReLU (negative_slope = 0.01); padded hidden columns stay exactly 0.
    h = jnp.maximum(h, LEAKY_SLOPE * h)

    # LayerNorm over the true HIDDEN (=300) features.  Padded columns are
    # exact zeros, so sums over the padded axis equal sums over 300 features;
    # divisors are explicit 1/300 (biased variance, like torch.nn.LayerNorm).
    inv_n = 1.0 / HIDDEN
    mean = jnp.sum(h, axis=-1, keepdims=True) * inv_n
    var = jnp.sum(h * h, axis=-1, keepdims=True) * inv_n - mean * mean
    hn = (h - mean) * jax.lax.rsqrt(var + LN_EPS)
    # gamma/beta were folded into w2/b2 in the wrapper; pad rows of w2 are 0,
    # so the (nonzero) padded columns of `hn` contribute nothing.

    # Linear(HIDDEN, OUT_DIM) + Sigmoid.
    y = jnp.dot(hn.astype(jnp.bfloat16), w2_ref[...],
                preferred_element_type=jnp.float32) + b2_ref[...]
    out_ref[...] = jax.nn.sigmoid(y)


@jax.jit
def generator_forward(x, params):
    """x: [GEN_INPUT] or [B, GEN_INPUT] f32 latents.

    Returns a [H, W, C] image (single latent) or [B, H, W, C] batch, in (0, 1).
    """
    w1, b1, gamma, beta, w2, b2 = params

    single = (x.ndim == 1)
    xb = x.reshape(1, GEN_INPUT) if single else x
    b = xb.shape[0]

    # Fold LayerNorm affine into the second linear:
    #   (hn * gamma + beta) @ w2 + b2 == hn @ (gamma[:, None] * w2) + (beta @ w2 + b2)
    w2_eff = gamma.reshape(HIDDEN, 1) * w2
    b2_eff = (b2 + beta.reshape(1, HIDDEN) @ w2).astype(jnp.float32)

    # Zero-pad to lane-dense shapes (pads are exact zeros -> no semantic change).
    w1_p = jnp.zeros((GEN_INPUT_PAD, HIDDEN_PAD), jnp.float32)
    w1_p = w1_p.at[:GEN_INPUT, :HIDDEN].set(w1)
    b1_p = jnp.zeros((1, HIDDEN_PAD), jnp.float32)
    b1_p = b1_p.at[:, :HIDDEN].set(b1.reshape(1, HIDDEN))
    w2_p = jnp.zeros((HIDDEN_PAD, OUT_DIM), jnp.float32)
    w2_p = w2_p.at[:HIDDEN, :].set(w2_eff)

    # bf16 MXU operands (halves weight DMA bytes); biases stay f32.
    w1_bf = w1_p.astype(jnp.bfloat16)
    w2_bf = w2_p.astype(jnp.bfloat16)

    # Pad the batch up to a multiple of BATCH_TILE and the latent dim to 128.
    bp = ((b + BATCH_TILE - 1) // BATCH_TILE) * BATCH_TILE
    x_p = jnp.zeros((bp, GEN_INPUT_PAD), jnp.float32)
    x_p = x_p.at[:b, :GEN_INPUT].set(xb.astype(jnp.float32))
    x_bf = x_p.astype(jnp.bfloat16)

    grid = (bp // BATCH_TILE,)
    out = pl.pallas_call(
        _generator_kernel,
        out_shape=jax.ShapeDtypeStruct((bp, OUT_DIM), jnp.float32),
        grid=grid,
        in_specs=[
            # Per-grid-step batch tile of latents.
            pl.BlockSpec((BATCH_TILE, GEN_INPUT_PAD), lambda i: (i, 0)),
            # Weights / biases: constant block index -> resident across steps.
            pl.BlockSpec((GEN_INPUT_PAD, HIDDEN_PAD), lambda i: (0, 0)),
            pl.BlockSpec((1, HIDDEN_PAD), lambda i: (0, 0)),
            pl.BlockSpec((HIDDEN_PAD, OUT_DIM), lambda i: (0, 0)),
            pl.BlockSpec((1, OUT_DIM), lambda i: (0, 0)),
        ],
        out_specs=pl.BlockSpec((BATCH_TILE, OUT_DIM), lambda i: (i, 0)),
        compiler_params=pltpu.CompilerParams(
            dimension_semantics=("parallel",)),
    )(x_bf, w1_bf, b1_p, w2_bf, b2_eff)

    # PyTorch: x.view(H, W, C) on each flat [OUT_DIM] row (row-major).
    imgs = out[:b].reshape(b, *IMG_SHAPE)
    return imgs[0] if single else imgs


def init_params(key):
    """Deterministic init mimicking PyTorch defaults (Linear: U(-1/sqrt(fan_in), +));
    LayerNorm: weight=1, bias=0."""
    k1, k2, k3, k4 = jax.random.split(key, 4)

    bound1 = 1.0 / math.sqrt(GEN_INPUT)
    w1 = jax.random.uniform(k1, (GEN_INPUT, HIDDEN), jnp.float32,
                            minval=-bound1, maxval=bound1)
    b1 = jax.random.uniform(k2, (1, HIDDEN), jnp.float32,
                            minval=-bound1, maxval=bound1)

    gamma = jnp.ones((1, HIDDEN), jnp.float32)
    beta = jnp.zeros((1, HIDDEN), jnp.float32)

    bound2 = 1.0 / math.sqrt(HIDDEN)
    w2 = jax.random.uniform(k3, (HIDDEN, OUT_DIM), jnp.float32,
                            minval=-bound2, maxval=bound2)
    b2 = jax.random.uniform(k4, (1, OUT_DIM), jnp.float32,
                            minval=-bound2, maxval=bound2)

    return (w1, b1, gamma, beta, w2, b2)


def reference_forward(xb, params):
    """Pure-JAX f32 reference matching the PyTorch module exactly."""
    w1, b1, gamma, beta, w2, b2 = params
    h = xb @ w1 + b1
    h = jnp.where(h >= 0.0, h, LEAKY_SLOPE * h)
    mean = jnp.mean(h, axis=-1, keepdims=True)
    var = jnp.mean((h - mean) ** 2, axis=-1, keepdims=True)
    hn = (h - mean) * jax.lax.rsqrt(var + LN_EPS) * gamma + beta
    y = hn @ w2 + b2
    return jax.nn.sigmoid(y).reshape(xb.shape[0], *IMG_SHAPE)


if __name__ == "__main__":
    key = jax.random.PRNGKey(0)
    k_params, k_x = jax.random.split(key)

    params = init_params(k_params)

    # Small batched demo: 16 latents -> 2 grid steps of the batch tile.
    B = 16
    x = jax.random.normal(k_x, (B, GEN_INPUT), jnp.float32)

    imgs = generator_forward(x, params)
    imgs = jax.block_until_ready(imgs)

    assert imgs.shape == (B,) + IMG_SHAPE, imgs.shape
    assert imgs.dtype == jnp.float32
    # Sigmoid output must lie in (0, 1).
    assert bool(jnp.all(imgs > 0.0)) and bool(jnp.all(imgs < 1.0))

    # Numerics vs. the f32 reference (bf16 matmul operands -> loose tolerance).
    ref = reference_forward(x, params)
    max_err = float(jnp.max(jnp.abs(imgs - ref)))
    assert max_err < 1e-2, max_err

    # Single-latent path (matches PyTorch's .view(H, W, C) for one vector).
    img1 = generator_forward(x[0], params)
    img1 = jax.block_until_ready(img1)
    assert img1.shape == IMG_SHAPE, img1.shape

    # TODO(synk): Adam optimiser / train() / plot_progress() are training-side
    # state and are intentionally not translated (forward pass only).
    print("KERNEL_OK")
</pallas_src>

<mosaic_0001>
module attributes {stable_mosaic.version = 11 : i64} {
  func.func @_generator_kernel(%arg0: i32, %arg1: memref<8x128xbf16, #tpu.memory_space<vmem>>, %arg2: memref<128x384xbf16, #tpu.memory_space<vmem>>, %arg3: memref<1x384xf32, #tpu.memory_space<vmem>>, %arg4: memref<384x384xbf16, #tpu.memory_space<vmem>>, %arg5: memref<1x384xf32, #tpu.memory_space<vmem>>, %arg6: memref<8x384xf32, #tpu.memory_space<vmem>>) attributes {dimension_semantics = [#tpu.dimension_semantics<parallel>], iteration_bounds = array<i64: 2>, scalar_prefetch = 0 : i64, scratch_operands = 0 : i64, tpu.core_type = #tpu.core_type<tc>, window_params = [{transform_indices = @transform_0, window_bounds = array<i64: 8, 128>}, {pipeline_mode = #tpu.pipeline_mode<synchronous>, transform_indices = @transform_1, window_bounds = array<i64: 128, 384>}, {pipeline_mode = #tpu.pipeline_mode<synchronous>, transform_indices = @transform_2, window_bounds = array<i64: 1, 384>}, {pipeline_mode = #tpu.pipeline_mode<synchronous>, transform_indices = @transform_3, window_bounds = array<i64: 384, 384>}, {pipeline_mode = #tpu.pipeline_mode<synchronous>, transform_indices = @transform_4, window_bounds = array<i64: 1, 384>}, {transform_indices = @transform_5, window_bounds = array<i64: 8, 384>}]} {
    %c0 = arith.constant 0 : index
    %c0_0 = arith.constant 0 : index
    %0 = vector.load %arg1[%c0, %c0_0] : memref<8x128xbf16, #tpu.memory_space<vmem>>, vector<8x128xbf16>
    %c0_1 = arith.constant 0 : index
    %c0_2 = arith.constant 0 : index
    %1 = vector.load %arg2[%c0_1, %c0_2] : memref<128x384xbf16, #tpu.memory_space<vmem>>, vector<128x384xbf16>
    %cst = arith.constant dense<0.000000e+00> : vector<8x384xf32>
    %2 = tpu.matmul %0, %1, %cst {dimension_numbers = #tpu.dot_dimension_numbers<[1], [0], [0], [1], [0, 0, 1, 1], [], []>} : vector<8x128xbf16>, vector<128x384xbf16>, vector<8x384xf32> -> vector<8x384xf32>
    %c0_3 = arith.constant 0 : index
    %c0_4 = arith.constant 0 : index
    %3 = vector.load %arg3[%c0_3, %c0_4] : memref<1x384xf32, #tpu.memory_space<vmem>>, vector<1x384xf32>
    %4 = vector.broadcast %3 : vector<1x384xf32> to vector<8x384xf32>
    %5 = arith.addf %2, %4 : vector<8x384xf32>
    %cst_5 = arith.constant 0.00999999977 : f32
    %6 = vector.broadcast %cst_5 : f32 to vector<8x384xf32>
    %7 = arith.mulf %6, %5 : vector<8x384xf32>
    %8 = arith.maximumf %5, %7 : vector<8x384xf32>
    %cst_6 = arith.constant dense<0.000000e+00> : vector<8xf32>
    %9 = vector.multi_reduction <add>, %8, %cst_6 [1] : vector<8x384xf32> to vector<8xf32>
    %10 = vector.shape_cast %9 : vector<8xf32> to vector<8x1xf32>
    %cst_7 = arith.constant 0.00333333341 : f32
    %11 = vector.broadcast %cst_7 : f32 to vector<8x1xf32>
    %12 = arith.mulf %10, %11 : vector<8x1xf32>
    %13 = arith.mulf %8, %8 : vector<8x384xf32>
    %cst_8 = arith.constant dense<0.000000e+00> : vector<8xf32>
    %14 = vector.multi_reduction <add>, %13, %cst_8 [1] : vector<8x384xf32> to vector<8xf32>
    %15 = vector.shape_cast %14 : vector<8xf32> to vector<8x1xf32>
    %cst_9 = arith.constant 0.00333333341 : f32
    %16 = vector.broadcast %cst_9 : f32 to vector<8x1xf32>
    %17 = arith.mulf %15, %16 : vector<8x1xf32>
    %18 = arith.mulf %12, %12 : vector<8x1xf32>
    %19 = arith.subf %17, %18 : vector<8x1xf32>
    %20 = vector.broadcast %12 : vector<8x1xf32> to vector<8x384xf32>
    %21 = arith.subf %8, %20 : vector<8x384xf32>
    %cst_10 = arith.constant 9.99999974E-6 : f32
    %22 = vector.broadcast %cst_10 : f32 to vector<8x1xf32>
    %23 = arith.addf %19, %22 : vector<8x1xf32>
    %24 = math.rsqrt %23 : vector<8x1xf32>
    %25 = vector.broadcast %24 : vector<8x1xf32> to vector<8x384xf32>
    %26 = arith.mulf %21, %25 : vector<8x384xf32>
    %27 = arith.truncf %26 : vector<8x384xf32> to vector<8x384xbf16>
    %c0_11 = arith.constant 0 : index
    %c0_12 = arith.constant 0 : index
    %28 = vector.load %arg4[%c0_11, %c0_12] : memref<384x384xbf16, #tpu.memory_space<vmem>>, vector<384x384xbf16>
    %cst_13 = arith.constant dense<0.000000e+00> : vector<8x384xf32>
    %29 = tpu.matmul %27, %28, %cst_13 {dimension_numbers = #tpu.dot_dimension_numbers<[1], [0], [0], [1], [0, 0, 1, 1], [], []>} : vector<8x384xbf16>, vector<384x384xbf16>, vector<8x384xf32> -> vector<8x384xf32>
    %c0_14 = arith.constant 0 : index
    %c0_15 = arith.constant 0 : index
    %30 = vector.load %arg5[%c0_14, %c0_15] : memref<1x384xf32, #tpu.memory_space<vmem>>, vector<1x384xf32>
    %31 = vector.broadcast %30 : vector<1x384xf32> to vector<8x384xf32>
    %32 = arith.addf %29, %31 : vector<8x384xf32>
    %33 = arith.negf %32 : vector<8x384xf32>
    %34 = math.exp %33 : vector<8x384xf32>
    %cst_16 = arith.constant 1.000000e+00 : f32
    %35 = vector.broadcast %cst_16 : f32 to vector<8x384xf32>
    %36 = arith.addf %35, %34 : vector<8x384xf32>
    %37 = arith.divf %35, %36 : vector<8x384xf32>
    %c0_17 = arith.constant 0 : index
    %c0_18 = arith.constant 0 : index
    %38 = vector.load %arg6[%c0_17, %c0_18] : memref<8x384xf32, #tpu.memory_space<vmem>>, vector<8x384xf32>
    tpu.vector_store %arg6[%c0_17, %c0_18], %37 {strides = array<i32>} : memref<8x384xf32, #tpu.memory_space<vmem>>, vector<8x384xf32>,
    return
  }
  func.func @transform_0(%arg0: i32) -> (i32, i32) {
    %c0_i32 = arith.constant 0 : i32
    %c0_i32_0 = arith.constant 0 : i32
    return %arg0, %c0_i32 : i32, i32
  }
  func.func @transform_1(%arg0: i32) -> (i32, i32) {
    %c0_i32 = arith.constant 0 : i32
    %c0_i32_0 = arith.constant 0 : i32
    %c0_i32_1 = arith.constant 0 : i32
    return %c0_i32, %c0_i32_0 : i32, i32
  }
  func.func @transform_2(%arg0: i32) -> (i32, i32) {
    %c0_i32 = arith.constant 0 : i32
    %c0_i32_0 = arith.constant 0 : i32
    %c0_i32_1 = arith.constant 0 : i32
    return %c0_i32, %c0_i32_0 : i32, i32
  }
  func.func @transform_3(%arg0: i32) -> (i32, i32) {
    %c0_i32 = arith.constant 0 : i32
    %c0_i32_0 = arith.constant 0 : i32
    %c0_i32_1 = arith.constant 0 : i32
    return %c0_i32, %c0_i32_0 : i32, i32
  }
  func.func @transform_4(%arg0: i32) -> (i32, i32) {
    %c0_i32 = arith.constant 0 : i32
    %c0_i32_0 = arith.constant 0 : i32
    %c0_i32_1 = arith.constant 0 : i32
    return %c0_i32, %c0_i32_0 : i32, i32
  }
  func.func @transform_5(%arg0: i32) -> (i32, i32) {
    %c0_i32 = arith.constant 0 : i32
    %c0_i32_0 = arith.constant 0 : i32
    return %arg0, %c0_i32 : i32, i32
  }
}

</mosaic_0001>

<bundles_post_ra>
// kernel: generator_forward.1
= control target key start
LH: loop header
LB: loop body
LE: loop exit
PB: predicated region body
PF: predicated region fallthrough
CT: control target
= control target key end

     0   :  { %s1638_s18 = smov 0   ;;  %s2026_s0 = inlined_call_operand.vmem [shape: bf16[16,128], index: 0, kind: input, shape index: {}]   ;;  %s2027_s1 = inlined_call_operand.vmem [shape: bf16[128,384], index: 1, kind: input, shape index: {}]   ;;  %s2028_s2 = inlined_call_operand.vmem [shape: f32[1,384], index: 2, kind: input, shape index: {}]   ;;  %s2029_s3 = inlined_call_operand.vmem [shape: bf16[384,384], index: 3, kind: input, shape index: {}]   ;;  %s2030_s4 = inlined_call_operand.vmem [shape: f32[1,384], index: 4, kind: input, shape index: {}]   ;;  %s2031_s5 = inlined_call_operand.vmem [shape: f32[16,384], index: 5, kind: output, shape index: {}]  }
   0x1 LB: > { %s1249_s19 = sadd.s32 4294967295, %s1603_s18   ;;  %p1253_p0 = scmp.ge.s32.totalorder %s1603_s18, 1  ;;  %s1603_s18 = sphi %s1638_s18, %s15_s18  }
   0x2   : > { %p186_p1 = scmp.lt.s32.totalorder %s1603_s18, 3 }
   0x4   : > { %p187_p2 = pnand %p1253_p0, %p186_p1 }
   0x5   : > { %v1455_v0 = vld [vmem:[%s2027_s1 + $0x4] ss:$12 sps:$4 sm:$0xff] (!%p187_p2)   ;;  %v1605_v1 = vmov (!%p187_p2), 0.0   ;;  %v1457_v2 = vld [vmem:[%s2027_s1] ss:$12 sps:$4 sm:$0xff] (!%p187_p2)   ;;  %v1606_v3 = vmov (!%p187_p2), 0   ;;  %v258_v51 = vlaneseq (!%p187_p2) }
   0x6   : > { %190 = sbr.rel (%p187_p2) target bundleno = 705 (0x2c1), region = 40  ;;  %1397 = vmatprep.subr.bf16.mxu1 (!%p187_p2), %v1605_v1  ;;  %433 = vmatprep.mubr.bf16.mxu0 (!%p187_p2), %v1606_v3  ;;  %v1458_v4 = vld [vmem:[%s2027_s1 + $0x8] ss:$12 sps:$4 sm:$0xff] (!%p187_p2)   ;;  %v1461_v6 = vld [vmem:[%s2027_s1 + $0x18] ss:$12 sps:$4 sm:$0xff] (!%p187_p2)   ;;  %vm1607_vm0 = vmmov (!%p187_p2), 0  }
   0x7   : > { %401 = vmatprep.subr.bf16.mxu0 (!%p187_p2), %v1455_v0  ;;  %v1459_v5 = vld [vmem:[%s2027_s1 + $0x1c] ss:$12 sps:$4 sm:$0xff] (!%p187_p2)   ;;  %1413 = vmatprep.mubr.msk.bf16.mxu1 (!%p187_p2), %vm1607_vm0, %v1605_v1  ;;  %v1462_v7 = vld [vmem:[%s2027_s1 + $0x20] ss:$12 sps:$4 sm:$0xff] (!%p187_p2)   ;;  %v1466_v10 = vld [vmem:[%s2027_s1 + $0x38] ss:$12 sps:$4 sm:$0xff] (!%p187_p2)  }
   0x8   : > { %402 = vmatpush1.bf16.msra.mxu0 (!%p187_p2), %v1457_v2  ;;  %1398 = vmatpush3.bf16.msra.mxu1 (!%p187_p2), %v1458_v4  ;;  %v1463_v8 = vld [vmem:[%s2027_s1 + $0x34] ss:$12 sps:$4 sm:$0xff] (!%p187_p2)   ;;  %v1465_v9 = vld [vmem:[%s2027_s1 + $0x30] ss:$12 sps:$4 sm:$0xff] (!%p187_p2)   ;;  %v1467_v11 = vld [vmem:[%s2027_s1 + $0x4c] ss:$12 sps:$4 sm:$0xff] (!%p187_p2)  }
   0x9   : > { %403 = vmatprep.subr.bf16.mxu0 (!%p187_p2), %v1459_v5  ;;  %1399 = vmatprep.subr.bf16.mxu1 (!%p187_p2), %v1605_v1  ;;  %v1469_v12 = vld [vmem:[%s2027_s1 + $0x48] ss:$12 sps:$4 sm:$0xff] (!%p187_p2)   ;;  %v1470_v13 = vld [vmem:[%s2027_s1 + $0x50] ss:$12 sps:$4 sm:$0xff] (!%p187_p2)   ;;  %v1473_v15 = vld [vmem:[%s2027_s1 + $0x60] ss:$12 sps:$4 sm:$0xff] (!%p187_p2)  }
   0xa   : > { %v1471_v14 = vld [vmem:[%s2027_s1 + $0x64] ss:$12 sps:$4 sm:$0xff] (!%p187_p2)   ;;  %p213_p3 = scmp.lt.s32.totalorder (!%p187_p2), %s1249_s19, 1  ;;  %v1474_v16 = vld [vmem:[%s2027_s1 + $0x68] ss:$12 sps:$4 sm:$0xff] (!%p187_p2)   ;;  %v1811_v52 = vshrl.u32 (!%p187_p2), %v258_v51, 7 }
   0xb   : > { %v1475_v17 = vld [vmem:[%s2027_s1 + $0x7c] ss:$12 sps:$4 sm:$0xff] (!%p187_p2)   ;;  %v1477_v18 = vld [vmem:[%s2027_s1 + $0x78] ss:$12 sps:$4 sm:$0xff] (!%p187_p2)   ;;  %v1478_v19 = vld [vmem:[%s2027_s1 + $0x80] ss:$12 sps:$4 sm:$0xff] (!%p187_p2)  }
   0xc   : > { %404 = vmatpush1.bf16.msra.mxu0 (!%p187_p2), %v1461_v6  ;;  %1400 = vmatpush3.bf16.msra.mxu1 (!%p187_p2), %v1462_v7  ;;  %v1479_v20 = vld [vmem:[%s2027_s1 + $0x94] ss:$12 sps:$4 sm:$0xff] (!%p187_p2)   ;;  %v1481_v21 = vld [vmem:[%s2027_s1 + $0x90] ss:$12 sps:$4 sm:$0xff] (!%p187_p2)   ;;  %v1482_v22 = vld [vmem:[%s2027_s1 + $0x98] ss:$12 sps:$4 sm:$0xff] (!%p187_p2)  }
   0xd   : > { %405 = vmatprep.subr.bf16.mxu0 %v1463_v8  ;;  %1401 = vmatprep.subr.bf16.mxu1 %v1605_v1  ;;  %s2033_s19 = smov (!%p213_p3, %s1249_s19), 1  ;;  %v1483_v23 = vld [vmem:[%s2027_s1 + $0xac] ss:$12 sps:$4 sm:$0xff]   ;;  %v1485_v24 = vld [vmem:[%s2027_s1 + $0xa8] ss:$12 sps:$4 sm:$0xff]   ;;  %v260_v53 = vsub.s32 0, %v1811_v52 }
   0xe   : > { %s1254_s16 = sshll.u32 %s2033_s19, 2  ;;  %v1486_v25 = vld [vmem:[%s2027_s1 + $0xb0] ss:$12 sps:$4 sm:$0xff]   ;;  %v1487_v27 = vld [vmem:[%s2029_s3] ss:$12 sps:$4 sm:$0xff]   ;;  %v268_v55 = vsub.s32 2, %v1811_v52 }
   0xf   : > { %s216_s25 = scalar_lea.vmem %s2026_s0, %s1254_s16  ;;  %v1489_v28 = vld [vmem:[%s2029_s3 + $0x4] ss:$12 sps:$4 sm:$0xff]   ;;  %v1492_v29 = vld [vmem:[%s2029_s3 + $0x1c] ss:$12 sps:$4 sm:$0xff]   ;;  %v1495_v31 = vld [vmem:[%s2029_s3 + $0x34] ss:$12 sps:$4 sm:$0xff]  }
  0x10   : > { %406 = vmatpush1.bf16.msra.mxu0 %v1465_v9  ;;  %1402 = vmatpush3.bf16.msra.mxu1 %v1466_v10  ;;  %v223_v26 = vld [vmem:[%s216_s25] sm:$0xf]  ;;  %v1490_v30 = vld [vmem:[%s2029_s3 + $0x18] ss:$12 sps:$4 sm:$0xff]   ;;  %v1514_v32 = vld [vmem:[%s2029_s3 + $0xc8] ss:$12 sps:$4 sm:$0xff]  }
  0x11   : > { %407 = vmatprep.subr.bf16.mxu0 %v1467_v11  ;;  %1403 = vmatprep.subr.bf16.mxu1 %v1605_v1  ;;  %v1515_v33 = vld [vmem:[%s2029_s3 + $0x8] ss:$12 sps:$4 sm:$0xff]   ;;  %v1493_v34 = vld [vmem:[%s2029_s3 + $0x30] ss:$12 sps:$4 sm:$0xff]   ;;  %v1519_v35 = vld [vmem:[%s2029_s3 + $0xe0] ss:$12 sps:$4 sm:$0xff]  }
  0x12   : > { %v1498_v36 = vld [vmem:[%s2029_s3 + $0x4c] ss:$12 sps:$4 sm:$0xff]   ;;  %v1496_v38 = vld [vmem:[%s2029_s3 + $0x48] ss:$12 sps:$4 sm:$0xff]   ;;  %v1501_v39 = vld [vmem:[%s2029_s3 + $0x64] ss:$12 sps:$4 sm:$0xff]  }
  0x13   : > { %v1520_v37 = vld [vmem:[%s2029_s3 + $0x20] ss:$12 sps:$4 sm:$0xff]   ;;  %v1504_v41 = vld [vmem:[%s2029_s3 + $0x7c] ss:$12 sps:$4 sm:$0xff]   ;;  %v1502_v42 = vld [vmem:[%s2029_s3 + $0x78] ss:$12 sps:$4 sm:$0xff]  }
  0x14   : > { %408 = vmatpush1.bf16.msra.mxu0 %v1469_v12  ;;  %1404 = vmatpush3.bf16.msra.mxu1 %v1470_v13  ;;  %v1499_v40 = vld [vmem:[%s2029_s3 + $0x60] ss:$12 sps:$4 sm:$0xff]   ;;  %v1505_v44 = vld [vmem:[%s2029_s3 + $0x90] ss:$12 sps:$4 sm:$0xff]   ;;  %v1508_v46 = vld [vmem:[%s2029_s3 + $0xa8] ss:$12 sps:$4 sm:$0xff]  }
  0x15   : > { %409 = vmatprep.subr.bf16.mxu0 %v1471_v14  ;;  %1405 = vmatprep.subr.bf16.mxu1 %v1605_v1  ;;  %v1507_v43 = vld [vmem:[%s2029_s3 + $0x94] ss:$12 sps:$4 sm:$0xff]   ;;  %v1510_v45 = vld [vmem:[%s2029_s3 + $0xac] ss:$12 sps:$4 sm:$0xff]   ;;  %v1513_v47 = vld [vmem:[%s2029_s3 + $0xc4] ss:$12 sps:$4 sm:$0xff]  }
  0x16   : > { %v1511_v48 = vld [vmem:[%s2029_s3 + $0xc0] ss:$12 sps:$4 sm:$0xff]   ;;  %v1518_v49 = vld [vmem:[%s2029_s3 + $0xdc] ss:$12 sps:$4 sm:$0xff]   ;;  %v1516_v50 = vld [vmem:[%s2029_s3 + $0xd8] ss:$12 sps:$4 sm:$0xff]  }
  0x17   : > { %v256_v54 = vld [vmem:[%s2028_s2] sm:$0x7]  ;;  %v264_v56 = vsub.s32 1, %v1811_v52  ;;  %s1443_s11 = smul.u32 24, %s2033_s19 }
  0x18   : > { %410 = vmatpush1.bf16.msra.mxu0 %v1473_v15  ;;  %1406 = vmatpush3.bf16.msra.mxu1 %v1474_v16  ;;  %v261_v57 = vrot.slane %v256_v54, %v260_v53  ;;  %v269_v58 = vrot.slane %v256_v54, %v268_v55 }
  0x19   : > { %411 = vmatprep.subr.bf16.mxu0 %v1475_v17  ;;  %1407 = vmatprep.subr.bf16.mxu1 %v1605_v1  ;;  %v265_v59 = vrot.slane %v256_v54, %v264_v56  ;;  %s221_s14 = scalar_lea.vmem %s2031_s5, %s1443_s11 }
  0x1c   : > { %412 = vmatpush1.bf16.msra.mxu0 %v1477_v18  ;;  %1408 = vmatpush3.bf16.msra.mxu1 %v1478_v19 }
  0x1d   : > { %413 = vmatprep.subr.bf16.mxu0 %v1479_v20  ;;  %1409 = vmatprep.subr.bf16.mxu1 %v1605_v1 }
  0x20   : > { %414 = vmatpush1.bf16.msra.mxu0 %v1481_v21  ;;  %1410 = vmatpush3.bf16.msra.mxu1 %v1482_v22  ;;  %v1523_v22 = vld [vmem:[%s2029_s3 + $0xf4] ss:$12 sps:$4 sm:$0xff]  }
  0x21   : > { %415 = vmatprep.subr.bf16.mxu0 %v1483_v23  ;;  %1411 = vmatprep.subr.bf16.mxu1 %v1605_v1  ;;  %v1524_v23 = vld [vmem:[%s2029_s3 + $0xf8] ss:$12 sps:$4 sm:$0xff]  }
  0x24   : > { %416 = vmatpush1.bf16.msra.mxu0 %v1485_v24  ;;  %1412 = vmatpush3.bf16.msra.mxu1 %v1486_v25  ;;  %v1521_v24 = vld [vmem:[%s2029_s3 + $0xf0] ss:$12 sps:$4 sm:$0xff]   ;;  %v1525_v25 = vld [vmem:[%s2029_s3 + $0x38] ss:$12 sps:$4 sm:$0xff]  }
  0x25   : > { %1011 = vmatprep.subr.bf16.mxu0 %v1489_v28  ;;  %1366 = vmatprep.subr.bf16.mxu1 %v1514_v32  ;;  %v1526_v28 = vld [vmem:[%s2029_s3 + $0x108] ss:$12 sps:$4 sm:$0xff]   ;;  %v1531_v32 = vld [vmem:[%s2029_s3 + $0x120] ss:$12 sps:$4 sm:$0xff]  }
  0x27   : > { %434 = vmatmul.mubr.bf16.vlgmr.msra.gmra.mrb[0].mxu0 %v223_v26  ;;  %1414 = vmatmul.mubr.bf16.vlgmr.msra.gmra.mrb[0].mxu1 %v223_v26  ;;  %v1528_v26 = vld [vmem:[%s2029_s3 + $0x10c] ss:$12 sps:$4 sm:$0xff]  }
  0x28   : > { %1012 = vmatpush1.bf16.msra.mxu0 %v1487_v27  ;;  %1367 = vmatpush3.bf16.msra.mxu1 %v1515_v33  ;;  %v1529_v27 = vld [vmem:[%s2029_s3 + $0x110] ss:$12 sps:$4 sm:$0xff]   ;;  %v1535_v33 = vld [vmem:[%s2029_s3 + $0x68] ss:$12 sps:$4 sm:$0xff]  }
  0x29   : > { %1013 = vmatprep.subr.bf16.mxu0 %v1492_v29  ;;  %1368 = vmatprep.subr.bf16.mxu1 %v1519_v35  ;;  %v1530_v29 = vld [vmem:[%s2029_s3 + $0x50] ss:$12 sps:$4 sm:$0xff]   ;;  %v1539_v35 = vld [vmem:[%s2029_s3 + $0x140] ss:$12 sps:$4 sm:$0xff]  }
  0x2c   : > { %1014 = vmatpush1.bf16.msra.mxu0 %v1490_v30  ;;  %1369 = vmatpush3.bf16.msra.mxu1 %v1520_v37  ;;  %v1533_v30 = vld [vmem:[%s2029_s3 + $0x124] ss:$12 sps:$4 sm:$0xff]   ;;  %v1540_v37 = vld [vmem:[%s2029_s3 + $0x80] ss:$12 sps:$4 sm:$0xff]  }
  0x2d   : > { %1015 = vmatprep.subr.bf16.mxu0 %v1495_v31  ;;  %1370 = vmatprep.subr.bf16.mxu1 %v1524_v23  ;;  %v1534_v31 = vld [vmem:[%s2029_s3 + $0x128] ss:$12 sps:$4 sm:$0xff]   ;;  %v1581_v23 = vld [vmem:[%s2029_s3 + $0x22c] ss:$12 sps:$4 sm:$0xff]  }
  0x30   : > { %1016 = vmatpush1.bf16.msra.mxu0 %v1493_v34  ;;  %1371 = vmatpush3.bf16.msra.mxu1 %v1525_v25  ;;  %v1538_v34 = vld [vmem:[%s2029_s3 + $0x13c] ss:$12 sps:$4 sm:$0xff]  }
  0x31   : > { %1017 = vmatprep.subr.bf16.mxu0 %v1498_v36  ;;  %1372 = vmatprep.subr.bf16.mxu1 %v1529_v27  ;;  %v1536_v36 = vld [vmem:[%s2029_s3 + $0x138] ss:$12 sps:$4 sm:$0xff]   ;;  %v1579_v25 = vld [vmem:[%s2029_s3 + $0x228] ss:$12 sps:$4 sm:$0xff]  }
  0x34   : > { %1018 = vmatpush1.bf16.msra.mxu0 %v1496_v38  ;;  %1373 = vmatpush3.bf16.msra.mxu1 %v1530_v29  ;;  %v1543_v38 = vld [vmem:[%s2029_s3 + $0x154] ss:$12 sps:$4 sm:$0xff]  }
  0x35   : > { %1019 = vmatprep.subr.bf16.mxu0 %v1501_v39  ;;  %1374 = vmatprep.subr.bf16.mxu1 %v1534_v31  ;;  %v1544_v39 = vld [vmem:[%s2029_s3 + $0x158] ss:$12 sps:$4 sm:$0xff]  }
  0x38   : > { %1020 = vmatpush1.bf16.msra.mxu0 %v1499_v40  ;;  %1375 = vmatpush3.bf16.msra.mxu1 %v1535_v33  ;;  %v1541_v40 = vld [vmem:[%s2029_s3 + $0x150] ss:$12 sps:$4 sm:$0xff]   ;;  %v610_v33 = vld [vmem:[%s2030_s4] sm:$0x7] }
  0x39   : > { %1021 = vmatprep.subr.bf16.mxu0 %v1504_v41  ;;  %1376 = vmatprep.subr.bf16.mxu1 %v1539_v35  ;;  %v1545_v41 = vld [vmem:[%s2029_s3 + $0x98] ss:$12 sps:$4 sm:$0xff]   ;;  %v619_v35 = vrot.slane %v610_v33, %v264_v56 }
  0x3c   : > { %1022 = vmatpush1.bf16.msra.mxu0 %v1502_v42  ;;  %1377 = vmatpush3.bf16.msra.mxu1 %v1540_v37  ;;  %v1548_v42 = vld [vmem:[%s2029_s3 + $0x16c] ss:$12 sps:$4 sm:$0xff]  }
  0x3d   : > { %1023 = vmatprep.subr.bf16.mxu0 %v1507_v43  ;;  %1378 = vmatprep.subr.bf16.mxu1 %v1544_v39  ;;  %v1549_v43 = vld [vmem:[%s2029_s3 + $0x170] ss:$12 sps:$4 sm:$0xff]  }
  0x40   : > { %1024 = vmatpush1.bf16.msra.mxu0 %v1505_v44  ;;  %1379 = vmatpush3.bf16.msra.mxu1 %v1545_v41  ;;  %v1546_v44 = vld [vmem:[%s2029_s3 + $0x168] ss:$12 sps:$4 sm:$0xff]  }
  0x41   : > { %1025 = vmatprep.subr.bf16.mxu0 %v1510_v45  ;;  %v1550_v45 = vld [vmem:[%s2029_s3 + $0xb0] ss:$12 sps:$4 sm:$0xff]   ;;  %1380 = vmatprep.subr.bf16.mxu1 %v1549_v43 }
  0x44   : > { %1026 = vmatpush1.bf16.msra.mxu0 %v1508_v46  ;;  %1381 = vmatpush3.bf16.msra.mxu1 %v1550_v45  ;;  %v1553_v46 = vld [vmem:[%s2029_s3 + $0x184] ss:$12 sps:$4 sm:$0xff]  }
  0x45   : > { %1027 = vmatprep.subr.bf16.mxu0 %v1513_v47  ;;  %1417 = vmatprep.subr.bf16.mxu1 %v1605_v1 }
  0x48   : > { %1028 = vmatpush1.bf16.msra.mxu0 %v1511_v48 }
  0x49   : > { %1029 = vmatprep.subr.bf16.mxu0 %v1518_v49 }
  0x4c   : > { %1030 = vmatpush1.bf16.msra.mxu0 %v1516_v50 }
  0x4d   : > { %1031 = vmatprep.subr.bf16.mxu0 %v1523_v22  ;;  %v1578_v22 = vld [vmem:[%s2029_s3 + $0x218] ss:$12 sps:$4 sm:$0xff]  }
  0x50   : > { %1032 = vmatpush1.bf16.msra.mxu0 %v1521_v24 }
  0x51   : > { %1033 = vmatprep.subr.bf16.mxu0 %v1528_v26  ;;  %v1582_v26 = vld [vmem:[%s2029_s3 + $0x230] ss:$12 sps:$4 sm:$0xff]  }
  0x54   : > { %1034 = vmatpush1.bf16.msra.mxu0 %v1526_v28 }
  0x55   : > { %1035 = vmatprep.subr.bf16.mxu0 %v1533_v30 }
  0x58   : > { %1036 = vmatpush1.bf16.msra.mxu0 %v1531_v32 }
  0x59   : > { %1037 = vmatprep.subr.bf16.mxu0 %v1538_v34  ;;  %v623_v34 = vrot.slane %v610_v33, %v268_v55 }
  0x5c   : > { %1038 = vmatpush1.bf16.msra.mxu0 %v1536_v36 }
  0x5d   : > { %1039 = vmatprep.subr.bf16.mxu0 %v1543_v38 }
  0x60   : > { %1040 = vmatpush1.bf16.msra.mxu0 %v1541_v40 }
  0x61   : > { %1041 = vmatprep.subr.bf16.mxu0 %v1548_v42 }
  0x64   : > { %1042 = vmatpush1.bf16.msra.mxu0 %v1546_v44 }
  0x65   : > { %1052 = vmatprep.subr.bf16.mxu0 %v1553_v46 }
  0xfa   : > { %v435_v60 = vpop.f32.mrb[0].mxu0  ;;  %v476_v62 = vpop.f32.mrb[0].mxu1 }
  0xfb   : > { %v436_v61 = vadd.f32 %v435_v60, %v261_v57  ;;  %v437_v63 = vpop.f32.mrb[1].mxu0  ;;  %v477_v0 = vadd.f32 %v476_v62, %v269_v58  ;;  %v1415_v4 = vpop.f32.mrb[1].mxu1 }
  0xfc   : > { %v438_v2 = vadd.f32 %v437_v63, %v265_v59  ;;  %v439_v5 = vpop.f32.mrb[2].mxu0  ;;  %v479_v7 = vpop.f32.mrb[2].mxu1  ;;  %v1554_v4 = vld [vmem:[%s2029_s3 + $0x188] ss:$12 sps:$4 sm:$0xff]  }
  0xfd   : > { %v482_v6 = vmul.f32 0.01, %v436_v61  ;;  %v440_v8 = vpop.f32.mrb[3].mxu0  ;;  %v484_v9 = vmul.f32 0.01, %v477_v0  ;;  %v1416_v11 = vpop.f32.mrb[3].mxu1 }
  0xfe   : > { %v483_v10 = vmul.f32 0.01, %v438_v2  ;;  %v1557_v5 = vld [vmem:[%s2029_s3 + $0x19c] ss:$12 sps:$4 sm:$0xff]   ;;  %v1558_v7 = vld [vmem:[%s2029_s3 + $0x1a0] ss:$12 sps:$4 sm:$0xff]  }
  0xff   : > { %v1825_v12 = vmax.f32 %v436_v61, %v482_v6  ;;  %v1831_v15 = vmax.f32 %v477_v0, %v484_v9  ;;  %v1551_v0 = vld [vmem:[%s2029_s3 + $0x180] ss:$12 sps:$4 sm:$0xff]   ;;  %v1555_v6 = vld [vmem:[%s2029_s3 + $0x198] ss:$12 sps:$4 sm:$0xff]   ;;  %v1559_v9 = vld [vmem:[%s2029_s3 + $0x1b0] ss:$12 sps:$4 sm:$0xff]  }
 0x100   : > { %v1827_v13 = vmax.f32 %v438_v2, %v483_v10  ;;  %v1561_v8 = vld [vmem:[%s2029_s3 + $0x1b4] ss:$12 sps:$4 sm:$0xff]   ;;  %v1562_v10 = vld [vmem:[%s2029_s3 + $0x1b8] ss:$12 sps:$4 sm:$0xff]  }
 0x101   : > { %v493_v14 = vmul.f32 %v1825_v12, %v1825_v12  ;;  %v495_v20 = vmul.f32 %v1831_v15, %v1831_v15  ;;  %v1563_v11 = vld [vmem:[%s2029_s3 + $0x1c8] ss:$12 sps:$4 sm:$0xff]  }
 0x102   : > { %v488_v16 = vadd.f32 %v1827_v13, %v1825_v12  ;;  %v494_v17 = vmul.f32 %v1827_v13, %v1827_v13 }
 0x104   : > { %v489_v18 = vadd.f32 %v488_v16, %v1831_v15  ;;  %v496_v19 = vadd.f32 %v494_v17, %v493_v14  ;;  %v1567_v14 = vld [vmem:[%s2029_s3 + $0x1e0] ss:$12 sps:$4 sm:$0xff]   ;;  %v1570_v16 = vld [vmem:[%s2029_s3 + $0x1e8] ss:$12 sps:$4 sm:$0xff]  }
 0x105   : > { %v1573_v17 = vld [vmem:[%s2029_s3 + $0x1fc] ss:$12 sps:$4 sm:$0xff]  }
 0x106   : > { %490 = vadd.xlane.f32.xlu0 %v489_v18  ;;  %v497_v21 = vadd.f32 %v496_v19, %v495_v20  ;;  %v1571_v18 = vld [vmem:[%s2029_s3 + $0x1f8] ss:$12 sps:$4 sm:$0xff]   ;;  %v1574_v19 = vld [vmem:[%s2029_s3 + $0x200] ss:$12 sps:$4 sm:$0xff]  }
 0x107   : > { %v1577_v20 = vld [vmem:[%s2029_s3 + $0x214] ss:$12 sps:$4 sm:$0xff]  }
 0x10a   : > { %498 = vadd.xlane.f32.xlu0 %v497_v21  ;;  %v1575_v21 = vld [vmem:[%s2029_s3 + $0x210] ss:$12 sps:$4 sm:$0xff]  }
 0x193   : > { %v491_v47 = vpop.xlane.xlu0 %490 }
 0x194   : > { %v1916_v48 = vmul.f32 0.0033333334, %v491_v47 }
 0x196   : > { %v501_v50 = vmul.f32 %v1916_v48, %v1916_v48  ;;  %v503_v58 = vsub.f32 %v1825_v12, %v1916_v48  ;;  %v504_v59 = vsub.f32 %v1827_v13, %v1916_v48  ;;  %v1566_v12 = vld [vmem:[%s2029_s3 + $0x1d0] ss:$12 sps:$4 sm:$0xff]   ;;  %v505_v24 = vsub.f32 %v1831_v15, %v1916_v48 }
 0x197   : > { %v499_v49 = vpop.xlane.xlu0 %498  ;;  %v1569_v13 = vld [vmem:[%s2029_s3 + $0x1e4] ss:$12 sps:$4 sm:$0xff]  }
 0x198   : > { %v500_v51 = vmul.f32 0.0033333334, %v499_v49 }
 0x19a   : > { %v502_v54 = vsub.f32 %v500_v51, %v501_v50 }
 0x19c   : > { %v506_v57 = vadd.f32 1e-05, %v502_v54 }
 0x19e   : > { %1583 = vrsqrt.f32 %v506_v57 }
 0x1a8   : > { %v1924_v60 = vpop.eup %1583 }
 0x1a9   : > { %v509_v61 = vmul.f32 %v1924_v60, %v504_v59  ;;  %v508_v62 = vmul.f32 %v1924_v60, %v503_v58  ;;  %v510_v27 = vmul.f32 %v1924_v60, %v505_v24 }
 0x1ab   : > { %v512_v63 = vpack.c.bf16 %v509_v61, %v509_v61  ;;  %v511_v2 = vpack.c.bf16 %v508_v62, %v508_v62  ;;  %v513_v28 = vpack.c.bf16 %v510_v27, %v510_v27 }
 0x1ad   : > { %1043 = vmatprep.mubr.bf16.mxu0 %v512_v63  ;;  %1125 = vmatprep.mubr.bf16.mxu1 %v512_v63 }
 0x1ae   : > { %1044 = vmatmul.mubr.bf16.vlgmr.msra.gmra.mrb[4].mxu0 %v511_v2  ;;  %1126 = vmatmul.mubr.bf16.vlgmr.msra.gmra.mrb[4].mxu1 %v511_v2 }
 0x1af   : > { %1053 = vmatpush1.bf16.msra.mxu0 %v1551_v0  ;;  %1418 = vmatpush3.bf16.msra.mxu1 %v1554_v4 }
 0x1b0   : > { %1054 = vmatprep.subr.bf16.mxu0 %v1557_v5  ;;  %1419 = vmatprep.subr.bf16.mxu1 %v1605_v1 }
 0x1b1   : > { %1084 = vmatprep.mubr.bf16.mxu0 %v1606_v3  ;;  %1433 = vmatprep.mubr.msk.bf16.mxu1 %vm1607_vm0, %v1605_v1  ;;  %v1565_v3 = vld [vmem:[%s2029_s3 + $0x1cc] ss:$12 sps:$4 sm:$0xff]  }
 0x1b3   : > { %1055 = vmatpush1.bf16.msra.mxu0 %v1555_v6  ;;  %1420 = vmatpush3.bf16.msra.mxu1 %v1558_v7 }
 0x1b4   : > { %1056 = vmatprep.subr.bf16.mxu0 %v1561_v8  ;;  %1421 = vmatprep.subr.bf16.mxu1 %v1605_v1 }
 0x1b7   : > { %1057 = vmatpush1.bf16.msra.mxu0 %v1559_v9  ;;  %1422 = vmatpush3.bf16.msra.mxu1 %v1562_v10 }
 0x1b8   : > { %1058 = vmatprep.subr.bf16.mxu0 %v1565_v3  ;;  %1423 = vmatprep.subr.bf16.mxu1 %v1605_v1 }
 0x1bb   : > { %1059 = vmatpush1.bf16.msra.mxu0 %v1563_v11  ;;  %1424 = vmatpush3.bf16.msra.mxu1 %v1566_v12 }
 0x1bc   : > { %1060 = vmatprep.subr.bf16.mxu0 %v1569_v13  ;;  %1425 = vmatprep.subr.bf16.mxu1 %v1605_v1 }
 0x1bf   : > { %1061 = vmatpush1.bf16.msra.mxu0 %v1567_v14  ;;  %1426 = vmatpush3.bf16.msra.mxu1 %v1570_v16 }
 0x1c0   : > { %1062 = vmatprep.subr.bf16.mxu0 %v1573_v17  ;;  %1427 = vmatprep.subr.bf16.mxu1 %v1605_v1 }
 0x1c3   : > { %1063 = vmatpush1.bf16.msra.mxu0 %v1571_v18  ;;  %1428 = vmatpush3.bf16.msra.mxu1 %v1574_v19 }
 0x1c4   : > { %1064 = vmatprep.subr.bf16.mxu0 %v1577_v20  ;;  %1429 = vmatprep.subr.bf16.mxu1 %v1605_v1 }
 0x1c7   : > { %1065 = vmatpush1.bf16.msra.mxu0 %v1575_v21  ;;  %1430 = vmatpush3.bf16.msra.mxu1 %v1578_v22 }
 0x1c8   : > { %1066 = vmatprep.subr.bf16.mxu0 %v1581_v23  ;;  %1431 = vmatprep.subr.bf16.mxu1 %v1605_v1  ;;  %v615_v1 = vrot.slane %v610_v33, %v260_v53 }
 0x1cb   : > { %1067 = vmatpush1.bf16.msra.mxu0 %v1579_v25  ;;  %1432 = vmatpush3.bf16.msra.mxu1 %v1582_v26 }
 0x1ce   : > { %1085 = vmatmul.mubr.bf16.vlgmr.msra.gmra.mrb[4].mxu0 %v513_v28  ;;  %1434 = vmatmul.mubr.bf16.vlgmr.msra.gmra.mrb[8].mxu1 %v513_v28 }
 0x281   : > { %v1382_v15 = vpop.f32.mrb[4].mxu1 }
 0x282   : > { %v1383_v29 = vpop.f32.mrb[5].mxu1 }
 0x283   : > { %v1384_v30 = vadd.f32 %v1383_v29, %v1382_v15  ;;  %v1385_v31 = vpop.f32.mrb[6].mxu1 }
 0x284   : > { %v1386_v32 = vpop.f32.mrb[7].mxu1 }
 0x285   : > { %v1128_v36 = vadd.f32 %v1384_v30, %v623_v34 }
 0x2a1   : > { %v1086_v37 = vpop.f32.mrb[4].mxu0  ;;  %v1167_v38 = vpop.f32.mrb[8].mxu1 }
 0x2a2   : > { %v1437_v39 = vadd.f32 %v1086_v37, %v615_v1  ;;  %v1168_v40 = vadd.f32 %v1167_v38, %v1128_v36  ;;  %v1088_v41 = vpop.f32.mrb[5].mxu0  ;;  %v1435_v42 = vpop.f32.mrb[9].mxu1 }
 0x2a3   : > { %v1438_v43 = vadd.f32 %v1088_v41, %v619_v35  ;;  %v1090_v44 = vpop.f32.mrb[6].mxu0  ;;  %v1170_v45 = vpop.f32.mrb[10].mxu1 }
 0x2a4   : > { %v1352_v46 = vmul.f32 -1.442695, %v1437_v39  ;;  %v1354_v47 = vmul.f32 -1.442695, %v1168_v40  ;;  %v1091_v55 = vpop.f32.mrb[7].mxu0  ;;  %v1436_v48 = vpop.f32.mrb[11].mxu1 }
 0x2a5   : > { %v1353_v49 = vmul.f32 -1.442695, %v1438_v43 }
 0x2a6   : > { %1585 = vpow2.f32 %v1352_v46 }
 0x2a7   : > { %1587 = vpow2.f32 %v1354_v47 }
 0x2a8   : > { %1589 = vpow2.f32 %v1353_v49 }
 0x2b0   : > { %v1586_v52 = vpop.eup %1585 }
 0x2b1   : > { %v1588_v53 = vpop.eup %1587  ;;  %v1182_v56 = vadd.f32 1.0, %v1586_v52 }
 0x2b2   : > { %v1590_v50 = vpop.eup %1589  ;;  %v1184_v51 = vadd.f32 1.0, %v1588_v53 }
 0x2b3   : > { %1591 = vrcp.f32 %v1182_v56  ;;  %v1183_v54 = vadd.f32 1.0, %v1590_v50 }
 0x2b4   : > { %1593 = vrcp.f32 %v1184_v51 }
 0x2b5   : > { %1595 = vrcp.f32 %v1183_v54 }
 0x2bd   : > { %v1592_v57 = vpop.eup %1591 }
 0x2be   : > { %v1594_v58 = vpop.eup %1593  ;;  %1191 = vst [vmem:[%s221_s14] sm:$0xff] %v1592_v57 }
 0x2bf   : > { %v1596_v59 = vpop.eup %1595  ;;  %1193 = vst [vmem:[%s221_s14 + $0x10] sm:$0xff] %v1594_v58 }
 0x2c0   : > { %1192 = vst [vmem:[%s221_s14 + $0x8] sm:$0xff] %v1596_v59 }
 0x2c1 PF: > { %s15_s18 = sadd.s32 1, %s1603_s18  }
 0x2c2   : > { %p12_p4 = scmp.ge.s32.totalorder %s15_s18, 4  }
 0x2c4   :  { %14 = sbr.rel (!%p12_p4) target bundleno = 1 (0x1), region = 70 }

</bundles_post_ra>
